<compile_context>
chip_gen: v5e
topology: v5e:2x2
jax: 0.10.0
libtpu: 0.0.40
codegen_flags: <defaults>
</compile_context>

<pallas_src>
import jax
import jax.numpy as jnp
from jax.experimental import pallas as pl
from jax.experimental.pallas import tpu as pltpu

MAX_TS = 1024  # spatial tile cap (lane axis); multiple of 128


def _round_up(n, m):
    return ((n + m - 1) // m) * m


# ----------------------------------------------------------------------------
# Stand-in TinySwinTransformer: global pool + linear embed + GELU -> (B, E).
# TODO(synk): TinySwinTransformer (window attention) is not defined in the
# reference file; this stand-in yields a per-batch vector of the expected
# shape (B, swin_embed_dim). It is tiny glue (one light pass over x plus a
# (Cin, E) matmul) and stays in plain JAX; it cannot be fused into the main
# kernel because the gate depends on a *global* spatial reduction of x.
# ----------------------------------------------------------------------------
def tiny_swin_stub(x_bcs, w_embed, b_embed):
    pooled = jnp.mean(x_bcs, axis=-1)               # (B, Cin)
    return jax.nn.gelu(pooled @ w_embed + b_embed)  # (B, E)


# ----------------------------------------------------------------------------
# Fused kernel: for one (batch, spatial-tile) grid point
#   y      = relu(W_unet @ x + b_unet)          (C,  TS)  (base UNet3D stub)
#   logits = (W_final * gate_b) @ y + b_final   (OC, TS)  gate folded into W
#   out    = softmax_OC(logits)                 (OC, TS)
# TODO(synk): base_unet3d internals are external to this module (passed in
# via __init__); its encoder/decoder is approximated by a 1x1x1 conv + ReLU.
# ----------------------------------------------------------------------------
def _fused_kernel(x_ref, wu_ref, bu_ref, weff_ref, bf_ref, o_ref):
    # x_ref:(1,Cin,TS) wu_ref:(C,Cin) bu_ref:(C,1) weff_ref:(1,OC,C)
    # bf_ref:(OC,1) o_ref:(1,OC,TS)
    y = jnp.dot(wu_ref[...], x_ref[0], preferred_element_type=jnp.float32)
    y = jnp.maximum(y + bu_ref[...], 0.0)                                # (C, TS)
    logits = jnp.dot(weff_ref[0], y,
                     preferred_element_type=jnp.float32) + bf_ref[...]   # (OC, TS)
    # Softmax over the output-channel (sublane) axis == nn.Softmax(dim=1).
    m = jnp.max(logits, axis=0, keepdims=True)
    e = jnp.exp(logits - m)
    # Exact divide kept (approx reciprocal would exceed the 1e-5 tolerance).
    o_ref[0] = (e / jnp.sum(e, axis=0, keepdims=True)).astype(o_ref.dtype)


def fused_unet_swin_gated_head(x_bcs, w_unet, b_unet, w_eff, b_final):
    B, Cin, S = x_bcs.shape
    C = w_unet.shape[0]
    OC = w_eff.shape[1]

    # Lane-dense tiling: widest tile (<= MAX_TS), zero-pad S up to a multiple
    # of it so no spatial remainder is silently dropped.
    ts = min(_round_up(S, 128), MAX_TS)
    s_pad = _round_up(S, ts)
    if s_pad != S:
        x_bcs = jnp.pad(x_bcs, ((0, 0), (0, 0), (0, s_pad - S)))

    out = pl.pallas_call(
        _fused_kernel,
        out_shape=jax.ShapeDtypeStruct((B, OC, s_pad), x_bcs.dtype),
        grid_spec=pltpu.PrefetchScalarGridSpec(
            num_scalar_prefetch=0,
            grid=(B, s_pad // ts),
            in_specs=[
                pl.BlockSpec((1, Cin, ts), lambda b_, s_: (b_, 0, s_)),
                pl.BlockSpec((C, Cin), lambda b_, s_: (0, 0)),
                pl.BlockSpec((C, 1), lambda b_, s_: (0, 0)),
                pl.BlockSpec((1, OC, C), lambda b_, s_: (b_, 0, 0)),
                pl.BlockSpec((OC, 1), lambda b_, s_: (0, 0)),
            ],
            out_specs=pl.BlockSpec((1, OC, ts), lambda b_, s_: (b_, 0, s_)),
        ),
        compiler_params=pltpu.CompilerParams(
            dimension_semantics=("parallel", "parallel")),
    )(x_bcs, w_unet, b_unet, w_eff, b_final)
    return out[:, :, :S]


def unet3d_with_swin_gated_fusion(x, params):
    """Eval-mode forward (softmax applied, matching `not self.training`)."""
    B, Cin, D, H, W = x.shape
    S = D * H * W
    x_bcs = x.reshape(B, Cin, S)

    # Per-batch gate, hoisted out of the per-tile kernel and folded into the
    # final-conv weights:  W @ (g * y) == (W * g) @ y.
    swin = tiny_swin_stub(x_bcs, params["w_embed"], params["b_embed"])  # (B, E)
    gate = jax.nn.sigmoid(swin @ params["w_gate"] + params["b_gate"])   # (B, C)
    w_eff = params["w_final"][None, :, :] * gate[:, None, :]            # (B, OC, C)

    out = fused_unet_swin_gated_head(
        x_bcs, params["w_unet"], params["b_unet"], w_eff, params["b_final"])
    OC = params["w_final"].shape[0]
    return out.reshape(B, OC, D, H, W)


if __name__ == "__main__":
    key = jax.random.PRNGKey(0)
    B, Cin, D, H, W = 2, 4, 8, 16, 16      # S = 2048 -> two 1024-wide tiles/batch
    C, OC, E = 8, 4, 32                    # unet feat chans, out chans, swin embed
    S = D * H * W
    ks = jax.random.split(key, 9)

    x = jax.random.normal(ks[0], (B, Cin, D, H, W), jnp.float32)

    params = dict(
        w_unet=0.3 * jax.random.normal(ks[1], (C, Cin), jnp.float32),
        b_unet=0.1 * jax.random.normal(ks[2], (C, 1), jnp.float32),
        w_embed=0.2 * jax.random.normal(ks[3], (Cin, E), jnp.float32),
        b_embed=0.05 * jax.random.normal(ks[4], (E,), jnp.float32),
        w_gate=0.2 * jax.random.normal(ks[5], (E, C), jnp.float32),
        b_gate=0.05 * jax.random.normal(ks[6], (1, C), jnp.float32),
        w_final=0.3 * jax.random.normal(ks[7], (OC, C), jnp.float32),
        b_final=0.1 * jax.random.normal(ks[8], (OC, 1), jnp.float32),
    )

    out = unet3d_with_swin_gated_fusion(x, params)
    out = jax.block_until_ready(out)

    # Pure-JAX reference for the module's forward semantics (eval mode).
    x_bcs = x.reshape(B, Cin, S)
    x_unet_ref = jnp.maximum(
        jnp.einsum("ci,bis->bcs", params["w_unet"], x_bcs)
        + params["b_unet"][None], 0.0)
    pooled = jnp.mean(x_bcs, axis=-1)
    swin_ref = jax.nn.gelu(pooled @ params["w_embed"] + params["b_embed"])
    gate_ref = jax.nn.sigmoid(swin_ref @ params["w_gate"] + params["b_gate"])
    fused = x_unet_ref * gate_ref[:, :, None]
    logits = (jnp.einsum("oc,bcs->bos", params["w_final"], fused)
              + params["b_final"][None])
    ref = jax.nn.softmax(logits, axis=1).reshape(B, OC, D, H, W)

    assert out.shape == (B, OC, D, H, W)
    assert jnp.allclose(out, ref, atol=1e-5, rtol=1e-5), "mismatch vs reference"
    print("KERNEL_OK")
</pallas_src>

<mosaic_0001>
module attributes {stable_mosaic.version = 11 : i64} {
  func.func @_fused_kernel(%arg0: i32, %arg1: i32, %arg2: memref<1x4x1024xf32, #tpu.memory_space<vmem>>, %arg3: memref<8x4xf32, #tpu.memory_space<vmem>>, %arg4: memref<8x1xf32, #tpu.memory_space<vmem>>, %arg5: memref<1x4x8xf32, #tpu.memory_space<vmem>>, %arg6: memref<4x1xf32, #tpu.memory_space<vmem>>, %arg7: memref<1x4x1024xf32, #tpu.memory_space<vmem>>) attributes {dimension_semantics = [#tpu.dimension_semantics<parallel>, #tpu.dimension_semantics<parallel>], iteration_bounds = array<i64: 2, 2>, scalar_prefetch = 0 : i64, scratch_operands = 0 : i64, tpu.core_type = #tpu.core_type<tc>, window_params = [{transform_indices = @transform_0, window_bounds = array<i64: 1, 4, 1024>}, {pipeline_mode = #tpu.pipeline_mode<synchronous>, transform_indices = @transform_1, window_bounds = array<i64: 8, 4>}, {pipeline_mode = #tpu.pipeline_mode<synchronous>, transform_indices = @transform_2, window_bounds = array<i64: 8, 1>}, {transform_indices = @transform_3, window_bounds = array<i64: 1, 4, 8>}, {pipeline_mode = #tpu.pipeline_mode<synchronous>, transform_indices = @transform_4, window_bounds = array<i64: 4, 1>}, {transform_indices = @transform_5, window_bounds = array<i64: 1, 4, 1024>}]} {
    %c0 = arith.constant 0 : index
    %c0_0 = arith.constant 0 : index
    %0 = vector.load %arg3[%c0, %c0_0] : memref<8x4xf32, #tpu.memory_space<vmem>>, vector<8x4xf32>
    %c0_1 = arith.constant 0 : index
    %c0_2 = arith.constant 0 : index
    %c0_3 = arith.constant 0 : index
    %1 = vector.load %arg2[%c0_1, %c0_2, %c0_3] : memref<1x4x1024xf32, #tpu.memory_space<vmem>>, vector<1x4x1024xf32>
    %2 = vector.shape_cast %1 : vector<1x4x1024xf32> to vector<4x1024xf32>
    %cst = arith.constant dense<0.000000e+00> : vector<8x1024xf32>
    %3 = tpu.matmul %0, %2, %cst {dimension_numbers = #tpu.dot_dimension_numbers<[1], [0], [0], [1], [0, 0, 1, 1], [], []>} : vector<8x4xf32>, vector<4x1024xf32>, vector<8x1024xf32> -> vector<8x1024xf32>
    %c0_4 = arith.constant 0 : index
    %c0_5 = arith.constant 0 : index
    %4 = vector.load %arg4[%c0_4, %c0_5] : memref<8x1xf32, #tpu.memory_space<vmem>>, vector<8x1xf32>
    %5 = vector.broadcast %4 : vector<8x1xf32> to vector<8x1024xf32>
    %6 = arith.addf %3, %5 : vector<8x1024xf32>
    %cst_6 = arith.constant 0.000000e+00 : f32
    %7 = vector.broadcast %cst_6 : f32 to vector<8x1024xf32>
    %8 = arith.maximumf %6, %7 : vector<8x1024xf32>
    %c0_7 = arith.constant 0 : index
    %c0_8 = arith.constant 0 : index
    %c0_9 = arith.constant 0 : index
    %9 = vector.load %arg5[%c0_7, %c0_8, %c0_9] : memref<1x4x8xf32, #tpu.memory_space<vmem>>, vector<1x4x8xf32>
    %10 = vector.shape_cast %9 : vector<1x4x8xf32> to vector<4x8xf32>
    %cst_10 = arith.constant dense<0.000000e+00> : vector<4x1024xf32>
    %11 = tpu.matmul %10, %8, %cst_10 {dimension_numbers = #tpu.dot_dimension_numbers<[1], [0], [0], [1], [0, 0, 1, 1], [], []>} : vector<4x8xf32>, vector<8x1024xf32>, vector<4x1024xf32> -> vector<4x1024xf32>
    %c0_11 = arith.constant 0 : index
    %c0_12 = arith.constant 0 : index
    %12 = vector.load %arg6[%c0_11, %c0_12] : memref<4x1xf32, #tpu.memory_space<vmem>>, vector<4x1xf32>
    %13 = vector.broadcast %12 : vector<4x1xf32> to vector<4x1024xf32>
    %14 = arith.addf %11, %13 : vector<4x1024xf32>
    %cst_13 = arith.constant dense<0xFF800000> : vector<1024xf32>
    %15 = vector.multi_reduction <maximumf>, %14, %cst_13 [0] : vector<4x1024xf32> to vector<1024xf32>
    %16 = vector.shape_cast %15 : vector<1024xf32> to vector<1x1024xf32>
    %17 = vector.broadcast %16 : vector<1x1024xf32> to vector<4x1024xf32>
    %18 = arith.subf %14, %17 : vector<4x1024xf32>
    %19 = math.exp %18 : vector<4x1024xf32>
    %cst_14 = arith.constant dense<0.000000e+00> : vector<1024xf32>
    %20 = vector.multi_reduction <add>, %19, %cst_14 [0] : vector<4x1024xf32> to vector<1024xf32>
    %21 = vector.shape_cast %20 : vector<1024xf32> to vector<1x1024xf32>
    %22 = vector.broadcast %21 : vector<1x1024xf32> to vector<4x1024xf32>
    %23 = arith.divf %19, %22 : vector<4x1024xf32>
    %c0_15 = arith.constant 0 : index
    %c0_16 = arith.constant 0 : index
    %c0_17 = arith.constant 0 : index
    %24 = vector.load %arg7[%c0_15, %c0_16, %c0_17] : memref<1x4x1024xf32, #tpu.memory_space<vmem>>, vector<1x4x1024xf32>
    %25 = vector.shape_cast %24 : vector<1x4x1024xf32> to vector<4x1024xf32>
    %26 = vector.shape_cast %23 : vector<4x1024xf32> to vector<1x4x1024xf32>
    tpu.vector_store %arg7[%c0_15, %c0_16, %c0_17], %26 {strides = array<i32>} : memref<1x4x1024xf32, #tpu.memory_space<vmem>>, vector<1x4x1024xf32>,
    return
  }
  func.func @transform_0(%arg0: i32, %arg1: i32) -> (i32, i32, i32) {
    %c0_i32 = arith.constant 0 : i32
    %c0_i32_0 = arith.constant 0 : i32
    return %arg0, %c0_i32, %arg1 : i32, i32, i32
  }
  func.func @transform_1(%arg0: i32, %arg1: i32) -> (i32, i32) {
    %c0_i32 = arith.constant 0 : i32
    %c0_i32_0 = arith.constant 0 : i32
    %c0_i32_1 = arith.constant 0 : i32
    return %c0_i32, %c0_i32_0 : i32, i32
  }
  func.func @transform_2(%arg0: i32, %arg1: i32) -> (i32, i32) {
    %c0_i32 = arith.constant 0 : i32
    %c0_i32_0 = arith.constant 0 : i32
    %c0_i32_1 = arith.constant 0 : i32
    return %c0_i32, %c0_i32_0 : i32, i32
  }
  func.func @transform_3(%arg0: i32, %arg1: i32) -> (i32, i32, i32) {
    %c0_i32 = arith.constant 0 : i32
    %c0_i32_0 = arith.constant 0 : i32
    %c0_i32_1 = arith.constant 0 : i32
    return %arg0, %c0_i32, %c0_i32_0 : i32, i32, i32
  }
  func.func @transform_4(%arg0: i32, %arg1: i32) -> (i32, i32) {
    %c0_i32 = arith.constant 0 : i32
    %c0_i32_0 = arith.constant 0 : i32
    %c0_i32_1 = arith.constant 0 : i32
    return %c0_i32, %c0_i32_0 : i32, i32
  }
  func.func @transform_5(%arg0: i32, %arg1: i32) -> (i32, i32, i32) {
    %c0_i32 = arith.constant 0 : i32
    %c0_i32_0 = arith.constant 0 : i32
    return %arg0, %c0_i32, %arg1 : i32, i32, i32
  }
}

</mosaic_0001>

<bundles_post_ra>
// kernel: tpu_custom_call.1
= control target key start
LH: loop header
LB: loop body
LE: loop exit
PB: predicated region body
PF: predicated region fallthrough
CT: control target
= control target key end

     0   :  { %10 = vsyncpa [#allocation3], 0  ;;  %s1683_s0 = inlined_call_operand.hbm [shape: f32[2,4,2048], index: 0, kind: input, shape index: {}]   ;;  %s1684_s1 = inlined_call_operand.vmem [shape: f32[8,4], index: 1, kind: input, shape index: {}]   ;;  %s1685_s2 = inlined_call_operand.vmem [shape: f32[8,1], index: 2, kind: input, shape index: {}]   ;;  %s1686_s3 = inlined_call_operand.vmem [shape: f32[2,4,8], index: 3, kind: input, shape index: {}]   ;;  %s1687_s4 = inlined_call_operand.vmem [shape: f32[4,1], index: 4, kind: input, shape index: {}]   ;;  %s1688_s5 = inlined_call_operand.hbm [shape: f32[2,4,2048], index: 5, kind: output, shape index: {}]  }
   0x1   :  { %12 = vsyncpa [#allocation3 + $0x1], 0 }
   0x2   :  { %13 = vsyncpa [#allocation4], 0 }
   0x3   :  { %15 = vsyncpa [#allocation4 + $0x1], 0  ;;  %s1383_s18 = smov 0   ;;  %s1385_s19 = smov 0  }
   0x4   :  { %s1387_s20 = smov 0   ;;  %s1389_s21 = smov 0  }
   0x5   :  { %s1391_s22 = smov 0   ;;  %s1393_s23 = smov 0  }
   0x6   :  { %s1395_s24 = smov 0   ;;  %s1397_s25 = smov 0  }
   0x7 LB: > { %s1068_s26 = sadd.s32 4294967295, %s1350_s25   ;;  %s1069_s27 = sadd.s32 4294967294, %s1350_s25   ;;  %s1350_s25 = sphi %s1397_s25, %s21_s25   ;;  %s1346_s24 = sphi %s1395_s24, %s1712_s24   ;;  %s1342_s23 = sphi %s1393_s23, %s1711_s23   ;;  %s1338_s22 = sphi %s1391_s22, %s1710_s22   ;;  %s1334_s21 = sphi %s1389_s21, %s1709_s21   ;;  %s1330_s20 = sphi %s1387_s20, %s1708_s20   ;;  %s1326_s19 = sphi %s1385_s19, %s1707_s19   ;;  %s1322_s18 = sphi %s1383_s18, %s1706_s18  }
   0x8   : > { %s30_s28 = sadd.s32 1, %s1342_s23  ;;  %s33_s29 = sadd.s32 1, %s1346_s24 }
   0x9   : > { %p31_p0 = scmp.ge.s32.totalorder %s30_s28, 2  ;;  %s42_s30 = sadd.s32 1, %s1330_s20 }
   0xa   : > { %p49_p1 = scmp.ne.s32.totalorder %s1330_s20, %s1326_s19  ;;  %p50_p2 = scmp.eq.s32.totalorder %s1350_s25, 0 }
   0xb   : > { %s1714_s28 = smov (%p31_p0, %s30_s28), 0  ;;  %s1716_s29 = smov (!%p31_p0, %s33_s29), %s1346_s24 }
   0xc   : > { %1692 = sst [smem:[#allocation8_spill]] %s1714_s28  ;;  %s38_s6 = ssub.s32 %s1342_s23, %s1714_s28 }
   0xd   : > { %p1436_p3 = por %p50_p2, %p49_p1  ;;  %p35_p4 = scmp.ge.s32.totalorder %s1716_s29, 2 }
   0xe   : > { %p55_p5 = scmp.ne.s32.totalorder %s1326_s19, %s1322_s18  ;;  %p56_p6 = scmp.eq.s32.totalorder %s1068_s26, 0 }
   0xf   : > { %p170_p7 = scmp.eq.s32.totalorder %s1068_s26, 3  ;;  %s1718_s29 = smov (%p35_p4, %s1716_s29), 0 }
  0x10   : > { %1694 = sst [smem:[#allocation9_spill]] %s1718_s29  ;;  %p1444_p8 = por %p56_p6, %p55_p5 }
  0x11   : > { %p1448_p9 = por %p170_p7, %p49_p1  ;;  %s37_s10 = ssub.s32 %s1346_s24, %s1718_s29 }
  0x12   : > { %p176_p10 = scmp.eq.s32.totalorder %s1069_s27, 3  ;;  %s39_s11 = sor.u32 %s38_s6, %s37_s10 }
  0x13   : > { %p40_p11 = scmp.eq.s32.totalorder %s39_s11, 0  ;;  %p1122_p13 = scmp.lt.s32.totalorder %s1350_s25, 4 }
  0x14   : > { %p1454_p12 = por %p176_p10, %p55_p5  ;;  %s205_s13 = sand.u32 1, %s1330_s20  }
  0x15   : > { %s1461_s14 = scalar_select %p40_p11, %s1330_s20, %s42_s30  }
  0x16   : > { %s1697_s12 = scalar_select %p1454_p12, 1, 0 }
  0x17   : > { %s1072_s15 = sshll.u32 %s205_s13, 5  ;;  %s1073_s16 = sshll.u32 %s1342_s23, 3 }
  0x18   : > { %1698 = sst [smem:[#allocation10_spill]] %s1697_s12  ;;  %s1074_s17 = sshll.u32 %s1346_s24, 4 }
  0x19   : > { %s209_s26 = scalar_lea.vmem [#allocation2], %s1072_s15  ;;  %s214_s29 = sadd.s32 %s1074_s17, %s1073_s16 }
  0x1a   : > { %s220_s28 = sshll.u32 %s209_s26, 4  ;;  %s1075_s27 = sshll.u32 %s214_s29, 2  ;;  %s221_s28 = int_to_ptr.vmem [resolvable:$true] %s220_s28 }
  0x1b   : > { %p1115_p0 = pnand %p1122_p13, %p1436_p3  ;;  %s216_s11 = scalar_lea.hbm %s1683_s0, %s1075_s27 }
  0x1c   : > { %p1076_p1 = scmp.ge.s32.totalorder %s1350_s25, 1  ;;  %s218_s12 = sshll.u32 %s216_s11, 4  ;;  %s219_s12 = int_to_ptr.hbm [resolvable:$true] %s218_s12 }
  0x1d   : > { %p232_p2 = scmp.lt.s32.totalorder %s1350_s25, 5  ;;  %s206_s30 = scalar_lea.sflag [#allocation3], %s205_s13 }
  0x1e   : > { %1117 = dma.hbm_to_vmem [thread:$0]  (!%p1115_p0), %s219_s12, 512, %s221_s28, %s206_s30  }
  0x1f   : > { %p233_p4 = pnand %p1076_p1, %p232_p2 }
  0x20   : > { %s1473_s15 = sand.u32 (!%p233_p4), 1, %s1326_s19  }
  0x21   : > { %236 = sbr.rel (%p233_p4) target bundleno = 404 (0x194), region = 40  ;;  %s1077_s29 = sshll.u32 (!%p233_p4), %s1473_s15, 5 }
  0x22   : > { %s239_s7 = scalar_lea.sflag (!%p233_p4), [#allocation3], %s1473_s15  ;;  %s242_s16 = scalar_lea.vmem (!%p233_p4), [#allocation2], %s1077_s29 }
  0x26   : > { %1313 = dma.done.wait (%p1444_p8), %s239_s7, 512  }
  0x27   : > { %1315 = vsyncadd (%p1444_p8), %s239_s7, 4294966784  ;;  %v1352_v0 = vmov 0   ;;  %v281_v1 = vld [vmem:[%s242_s16] sm:$0xff]  ;;  %v282_v2 = vld [vmem:[%s242_s16 + $0x8] sm:$0xff]  ;;  %vm314_vm0 = vcmask 1043456   ;;  %vm310_vm1 = vcmask 31744  }
  0x28   : > { %1189 = vset.pattern.permute.xlu0 %v1352_v0  ;;  %295 = vst [vmem:[#allocation1] ss:$2 sm:$0xff] %v281_v1  ;;  %v283_v3 = vld [vmem:[%s242_s16 + $0x10] sm:$0xff]  ;;  %v284_v4 = vld [vmem:[%s242_s16 + $0x18] sm:$0xff]  ;;  %p275_p3 = scmp.lt.s32.totalorder %s1338_s22, 1  ;;  %vm506_vm2 = vcmask 64512  }
  0x29   : > { %v285_v5 = vld [vmem:[%s1685_s2] sm:$0xff]  ;;  %297 = vst [vmem:[#allocation1 + $0x10] ss:$2 sm:$0xff] %v282_v2  ;;  %s1600_s7 = scalar_lea.vmem [#allocation5], %s1077_s29  ;;  %s1105_s29 = sshll.u32 %s1334_s21, 3 }
  0x2a   : > { %288 = vperm.xlu0 %1189, %v285_v5   ;;  %299 = vst [vmem:[#allocation1 + $0x20] ss:$2 sm:$0xff] %v283_v3  ;;  %v280_v6 = vld [vmem:[%s1684_s1] sm:$0xff]  ;;  %s276_s27 = scalar_select %p275_p3, %s1338_s22, 1 }
  0x2b   : > { %301 = vst [vmem:[#allocation1 + $0x30] ss:$2 sm:$0xff] %v284_v4  ;;  %v500_v15 = vld [vmem:[%s1687_s4] sm:$0xf]  ;;  %s1106_s16 = sshll.u32 %s1338_s22, 4  ;;  %s966_s17 = sshll.u32 %s1600_s7, 4  ;;  %s967_s17 = int_to_ptr.vmem [resolvable:$true] %s966_s17 }
  0x2c   : > { %s1079_s6 = sshll.u32 %s276_s27, 2  ;;  %s962_s28 = sadd.s32 %s1106_s16, %s1105_s29 }
  0x2d   : > { %s278_s30 = scalar_lea.vmem %s1686_s3, %s1079_s6  ;;  %s1107_s12 = sshll.u32 %s962_s28, 2 }
  0x2e   : > { %v499_v23 = vld [vmem:[%s278_s30] sm:$0xf]  ;;  %s964_s13 = scalar_lea.hbm %s1688_s5, %s1107_s12  ;;  %s951_s26 = scalar_lea.sflag [#allocation4], %s1473_s15 }
  0x2f   : > { %v302_v7 = vld.sshfl [vmem:[#allocation1] sm:$0xff pattern:$0x75316420]  ;;  %v303_v8 = vld.sshfl [vmem:[#allocation1 + $0x8] sm:$0xff pattern:$0x75316420] }
  0x30   : > { %1080 = vmatpush.msk.msra.mxu0 %vm314_vm0, %v302_v7  ;;  %1082 = vmatpush.msk.msra.mxu1 %vm314_vm0, %v303_v8  ;;  %v304_v9 = vld.sshfl [vmem:[#allocation1 + $0x10] sm:$0xff pattern:$0x75316420]  ;;  %v305_v10 = vld.sshfl [vmem:[#allocation1 + $0x18] sm:$0xff pattern:$0x75316420] }
  0x31   : > { %1084 = vmatpush.msk.msra.mxu2 %vm314_vm0, %v304_v9  ;;  %1086 = vmatpush.msk.msra.mxu3 %vm314_vm0, %v305_v10  ;;  %v306_v11 = vld.sshfl [vmem:[#allocation1 + $0x20] sm:$0xff pattern:$0x75316420]  ;;  %v307_v12 = vld.sshfl [vmem:[#allocation1 + $0x28] sm:$0xff pattern:$0x75316420] }
  0x32   : > { %1081 = vmatmul.msk.f32.vlgmr.msra.gmra.mxu0 %vm310_vm1, %v280_v6  ;;  %1083 = vmatmul.msk.f32.vlgmr.msra.gmra.mxu1 %vm310_vm1, %v280_v6  ;;  %v308_v13 = vld.sshfl [vmem:[#allocation1 + $0x30] sm:$0xff pattern:$0x75316420]  ;;  %v309_v14 = vld.sshfl [vmem:[#allocation1 + $0x38] sm:$0xff pattern:$0x75316420] }
  0x33   : > { %1085 = vmatmul.msk.f32.vlgmr.msra.gmra.mxu2 %vm310_vm1, %v280_v6  ;;  %1087 = vmatmul.msk.f32.vlgmr.msra.gmra.mxu3 %vm310_vm1, %v280_v6  ;;  %s968_s8 = sshll.u32 %s964_s13, 4  ;;  %s1272_s30 = scalar_lea.hbm %s1688_s5, 128  ;;  %s969_s8 = int_to_ptr.hbm [resolvable:$true] %s968_s8 }
  0x34   : > { %1088 = vmatpush.msk.msrb.mxu0 %vm314_vm0, %v306_v11  ;;  %1090 = vmatpush.msk.msrb.mxu1 %vm314_vm0, %v307_v12  ;;  %s1266_s27 = sshra.s32 %s969_s8, 4  ;;  %s1267_s27 = int_to_ptr.hbm [resolvable:$true] %s1266_s27 }
  0x35   : > { %1092 = vmatpush.msk.msrb.mxu2 %vm314_vm0, %v308_v13  ;;  %1094 = vmatpush.msk.msrb.mxu3 %vm314_vm0, %v309_v14  ;;  %s1268_s6 = scalar_lea.hbm %s1267_s27, 32  ;;  %p1273_p8 = scmp.lt.s32.totalorder %s1267_s27, %s1688_s5 }
  0x36   : > { %503 = vperm.xlu0 %1189, %v500_v15   ;;  %p1269_p5 = scmp.ne.s32.totalorder %s1267_s27, %s1268_s6  ;;  %p1274_p10 = scmp.lt.s32.totalorder %s1272_s30, %s1268_s6 }
  0x38   : > { %p1270_p6 = pnand %p1269_p5, %p1448_p9  ;;  %p1275_p11 = por %p1274_p10, %p1273_p8 }
  0x3a   : > { %1089 = vmatmul.msk.f32.vlgmr.msrb.gmra.mxu0 %vm310_vm1, %v280_v6  ;;  %1091 = vmatmul.msk.f32.vlgmr.msrb.gmra.mxu1 %vm310_vm1, %v280_v6  ;;  %p1271_p7 = pneg %p1270_p6 }
  0x3b   : > { %1093 = vmatmul.msk.f32.vlgmr.msrb.gmra.mxu2 %vm310_vm1, %v280_v6  ;;  %1095 = vmatmul.msk.f32.vlgmr.msrb.gmra.mxu3 %vm310_vm1, %v280_v6 }
  0x3c   : > { %p1276_p13 = pnand %p1275_p11, %p1271_p7 }
  0x9c   : > { %v289_v16 = vpop.permute.xlu0 %288 }
  0xa8   : > { %v504_v42 = vpop.permute.xlu0 %503 }
  0xaf   : > { %v348_v17 = vpop.f32.mrf.mxu0  ;;  %v368_v18 = vpop.f32.mrf.mxu1 }
  0xb0   : > { %v349_v19 = vadd.f32 %v348_v17, %v289_v16  ;;  %v369_v20 = vadd.f32 %v368_v18, %v289_v16 }
  0xb2   : > { %v491_v21 = vmax.f32 %v349_v19, 0.0  ;;  %v492_v22 = vmax.f32 %v369_v20, 0.0 }
  0xb4   : > { %525 = vmatpush.msra.mxu0 %v491_v21  ;;  %545 = vmatpush.msra.mxu1 %v492_v22 }
  0xb5   : > { %1096 = vmatmul.msk.f32.vlgmr.msra.gmra.mxu0 %vm506_vm2, %v499_v23  ;;  %1097 = vmatmul.msk.f32.vlgmr.msra.gmra.mxu1 %vm506_vm2, %v499_v23 }
  0xb6   : > { %v388_v24 = vpop.f32.mrf.mxu2  ;;  %v408_v25 = vpop.f32.mrf.mxu3 }
  0xb7   : > { %v389_v26 = vadd.f32 %v388_v24, %v289_v16  ;;  %v409_v27 = vadd.f32 %v408_v25, %v289_v16  ;;  %v428_v28 = vpop.f32.mrf.mxu0  ;;  %v448_v29 = vpop.f32.mrf.mxu1 }
  0xb8   : > { %v429_v30 = vadd.f32 %v428_v28, %v289_v16  ;;  %v449_v31 = vadd.f32 %v448_v29, %v289_v16 }
  0xb9   : > { %v493_v32 = vmax.f32 %v389_v26, 0.0  ;;  %v494_v33 = vmax.f32 %v409_v27, 0.0 }
  0xba   : > { %v495_v34 = vmax.f32 %v429_v30, 0.0  ;;  %v496_v35 = vmax.f32 %v449_v31, 0.0 }
  0xbb   : > { %565 = vmatpush.msra.mxu2 %v493_v32  ;;  %585 = vmatpush.msra.mxu3 %v494_v33 }
  0xbc   : > { %1098 = vmatmul.msk.f32.vlgmr.msra.gmra.mxu2 %vm506_vm2, %v499_v23  ;;  %1099 = vmatmul.msk.f32.vlgmr.msra.gmra.mxu3 %vm506_vm2, %v499_v23 }
  0xbd   : > { %605 = vmatpush.msrb.mxu0 %v495_v34  ;;  %625 = vmatpush.msrb.mxu1 %v496_v35 }
  0xbe   : > { %v468_v36 = vpop.f32.mrf.mxu2  ;;  %v488_v37 = vpop.f32.mrf.mxu3  ;;  %1100 = vmatmul.msk.f32.vlgmr.msrb.gmra.mxu0 %vm506_vm2, %v499_v23  ;;  %1101 = vmatmul.msk.f32.vlgmr.msrb.gmra.mxu1 %vm506_vm2, %v499_v23 }
  0xbf   : > { %v469_v38 = vadd.f32 %v468_v36, %v289_v16  ;;  %v489_v39 = vadd.f32 %v488_v37, %v289_v16 }
  0xc1   : > { %v497_v40 = vmax.f32 %v469_v38, 0.0  ;;  %v498_v41 = vmax.f32 %v489_v39, 0.0 }
  0xc3   : > { %645 = vmatpush.msrb.mxu2 %v497_v40  ;;  %665 = vmatpush.msrb.mxu3 %v498_v41 }
  0xc4   : > { %1102 = vmatmul.msk.f32.vlgmr.msrb.gmra.mxu2 %vm506_vm2, %v499_v23  ;;  %1103 = vmatmul.msk.f32.vlgmr.msrb.gmra.mxu3 %vm506_vm2, %v499_v23 }
 0x132   : > { %v527_v43 = vpop.f32.mrf.mxu0  ;;  %v547_v44 = vpop.f32.mrf.mxu1 }
 0x133   : > { %v528_v45 = vadd.f32 %v527_v43, %v504_v42  ;;  %v548_v46 = vadd.f32 %v547_v44, %v504_v42 }
 0x135   : > { %v670_v47 = vsel %vm314_vm0, %v528_v45, -inf  ;;  %v677_v48 = vsel %vm314_vm0, %v548_v46, -inf }
 0x136   : > { %v671_v49 = vrot.slane %v670_v47, 4  ;;  %v678_v50 = vrot.slane %v677_v48, 4 }
 0x138   : > { %v672_v51 = vmax.f32 %v670_v47, %v671_v49  ;;  %v679_v52 = vmax.f32 %v677_v48, %v678_v50 }
 0x13a   : > { %v673_v53 = vrot.slane %v672_v51, 2  ;;  %v680_v54 = vrot.slane %v679_v52, 2 }
 0x13b   : > { %v607_v55 = vpop.f32.mrf.mxu0  ;;  %v627_v56 = vpop.f32.mrf.mxu1 }
 0x13c   : > { %v674_v57 = vmax.f32 %v672_v51, %v673_v53  ;;  %v681_v58 = vmax.f32 %v679_v52, %v680_v54  ;;  %v608_v59 = vadd.f32 %v607_v55, %v504_v42  ;;  %v628_v60 = vadd.f32 %v627_v56, %v504_v42 }
 0x13e   : > { %v675_v61 = vrot.slane %v674_v57, 1  ;;  %v682_v62 = vrot.slane %v681_v58, 1  ;;  %v698_v63 = vsel %vm314_vm0, %v608_v59, -inf  ;;  %v705_v0 = vsel %vm314_vm0, %v628_v60, -inf }
 0x13f   : > { %v699_v1 = vrot.slane %v698_v63, 4  ;;  %v706_v2 = vrot.slane %v705_v0, 4  ;;  %v567_v3 = vpop.f32.mrf.mxu2  ;;  %v587_v4 = vpop.f32.mrf.mxu3 }
 0x140   : > { %v676_v5 = vmax.f32 %v674_v57, %v675_v61  ;;  %v683_v6 = vmax.f32 %v681_v58, %v682_v62  ;;  %v568_v7 = vadd.f32 %v567_v3, %v504_v42  ;;  %v588_v8 = vadd.f32 %v587_v4, %v504_v42 }
 0x141   : > { %v700_v9 = vmax.f32 %v698_v63, %v699_v1  ;;  %v707_v10 = vmax.f32 %v705_v0, %v706_v2 }
 0x142   : > { %v726_v11 = vsub.f32 %v528_v45, %v676_v5  ;;  %v727_v12 = vsub.f32 %v548_v46, %v683_v6  ;;  %v684_v13 = vsel %vm314_vm0, %v568_v7, -inf  ;;  %v691_v14 = vsel %vm314_vm0, %v588_v8, -inf }
 0x143   : > { %v701_v15 = vrot.slane %v700_v9, 2  ;;  %v708_v16 = vrot.slane %v707_v10, 2  ;;  %v685_v17 = vrot.slane %v684_v13, 4  ;;  %v692_v18 = vrot.slane %v691_v14, 4 }
 0x144   : > { %v734_v19 = vmul.f32 1.442695, %v726_v11  ;;  %v736_v20 = vmul.f32 1.442695, %v727_v12 }
 0x145   : > { %v702_v21 = vmax.f32 %v700_v9, %v701_v15  ;;  %v709_v22 = vmax.f32 %v707_v10, %v708_v16  ;;  %v686_v23 = vmax.f32 %v684_v13, %v685_v17  ;;  %v693_v24 = vmax.f32 %v691_v14, %v692_v18 }
 0x146   : > { %1190 = vpow2.f32 %v734_v19 }
 0x147   : > { %1192 = vpow2.f32 %v736_v20  ;;  %v703_v25 = vrot.slane %v702_v21, 1  ;;  %v710_v26 = vrot.slane %v709_v22, 1  ;;  %v687_v27 = vrot.slane %v686_v23, 2  ;;  %v647_v28 = vpop.f32.mrf.mxu2  ;;  %v667_v29 = vpop.f32.mrf.mxu3 }
 0x148   : > { %v694_v30 = vrot.slane %v693_v24, 2  ;;  %v1527_v31 = vadd.f32 %v647_v28, %v504_v42  ;;  %v1529_v32 = vadd.f32 %v667_v29, %v504_v42 }
 0x149   : > { %v704_v33 = vmax.f32 %v702_v21, %v703_v25  ;;  %v711_v34 = vmax.f32 %v709_v22, %v710_v26  ;;  %v688_v35 = vmax.f32 %v686_v23, %v687_v27 }
 0x14a   : > { %v695_v36 = vmax.f32 %v693_v24, %v694_v30  ;;  %v712_v37 = vsel %vm314_vm0, %v1527_v31, -inf  ;;  %v719_v38 = vsel %vm314_vm0, %v1529_v32, -inf }
 0x14b   : > { %v730_v39 = vsub.f32 %v608_v59, %v704_v33  ;;  %v731_v40 = vsub.f32 %v628_v60, %v711_v34  ;;  %v689_v41 = vrot.slane %v688_v35, 1  ;;  %v713_v43 = vrot.slane %v712_v37, 4 }
 0x14c   : > { %v1535_v44 = vpop.eup %1190  ;;  %v696_v45 = vrot.slane %v695_v36, 1  ;;  %v720_v46 = vrot.slane %v719_v38, 4 }
 0x14d   : > { %v1537_v42 = vpop.eup %1192  ;;  %v750_v47 = vsel %vm314_vm0, %v1535_v44, 0.0  ;;  %v742_v48 = vmul.f32 1.442695, %v730_v39  ;;  %v744_v49 = vmul.f32 1.442695, %v731_v40  ;;  %v690_v50 = vmax.f32 %v688_v35, %v689_v41 }
 0x14e   : > { %v751_v51 = vrot.slane %v750_v47, 4  ;;  %v757_v52 = vsel %vm314_vm0, %v1537_v42, 0.0  ;;  %v697_v53 = vmax.f32 %v695_v36, %v696_v45  ;;  %v714_v54 = vmax.f32 %v712_v37, %v713_v43 }
 0x14f   : > { %v758_v55 = vrot.slane %v757_v52, 4  ;;  %1194 = vpow2.f32 %v742_v48  ;;  %v728_v56 = vsub.f32 %v568_v7, %v690_v50  ;;  %v721_v57 = vmax.f32 %v719_v38, %v720_v46 }
 0x150   : > { %v752_v58 = vadd.f32 %v751_v51, %v750_v47  ;;  %1196 = vpow2.f32 %v744_v49  ;;  %v729_v59 = vsub.f32 %v588_v8, %v697_v53  ;;  %v715_v60 = vrot.slane %v714_v54, 2 }
 0x151   : > { %v759_v61 = vadd.f32 %v758_v55, %v757_v52  ;;  %v738_v62 = vmul.f32 1.442695, %v728_v56  ;;  %v722_v63 = vrot.slane %v721_v57, 2 }
 0x152   : > { %v753_v0 = vrot.slane %v752_v58, 2  ;;  %v740_v1 = vmul.f32 1.442695, %v729_v59  ;;  %v716_v2 = vmax.f32 %v714_v54, %v715_v60 }
 0x153   : > { %v760_v3 = vrot.slane %v759_v61, 2  ;;  %1198 = vpow2.f32 %v738_v62  ;;  %v723_v4 = vmax.f32 %v721_v57, %v722_v63 }
 0x154   : > { %v754_v5 = vadd.f32 %v753_v0, %v752_v58  ;;  %1200 = vpow2.f32 %v740_v1  ;;  %v717_v6 = vrot.slane %v716_v2, 1 }
 0x155   : > { %v1543_v9 = vpop.eup %1194  ;;  %v761_v7 = vadd.f32 %v760_v3, %v759_v61  ;;  %v724_v10 = vrot.slane %v723_v4, 1 }
 0x156   : > { %v1545_v11 = vpop.eup %1196  ;;  %v755_v8 = vrot.slane %v754_v5, 1  ;;  %v778_v12 = vsel %vm314_vm0, %v1543_v9, 0.0  ;;  %v718_v16 = vmax.f32 %v716_v2, %v717_v6 }
 0x157   : > { %v762_v13 = vrot.slane %v761_v7, 1  ;;  %v779_v14 = vrot.slane %v778_v12, 4  ;;  %v785_v15 = vsel %vm314_vm0, %v1545_v11, 0.0  ;;  %v725_v22 = vmax.f32 %v723_v4, %v724_v10 }
 0x158   : > { %v756_v17 = vadd.f32 %v755_v8, %v754_v5  ;;  %v786_v18 = vrot.slane %v785_v15, 4  ;;  %v732_v24 = vsub.f32 %v1527_v31, %v718_v16 }
 0x159   : > { %v1551_v19 = vpop.eup %1198  ;;  %v1553_v20 = vadd.f32 %v762_v13, %v761_v7  ;;  %v780_v21 = vadd.f32 %v779_v14, %v778_v12  ;;  %v733_v29 = vsub.f32 %v1529_v32, %v725_v22 }
 0x15a   : > { %v1555_v23 = vpop.eup %1200  ;;  %1202 = vrcp.f32 %v756_v17  ;;  %v787_v26 = vadd.f32 %v786_v18, %v785_v15  ;;  %v764_v27 = vsel %vm314_vm0, %v1551_v19, 0.0  ;;  %v746_v36 = vmul.f32 1.442695, %v732_v24 }
 0x15b   : > { %1204 = vrcp.f32 %v1553_v20  ;;  %v781_v25 = vrot.slane %v780_v21, 2  ;;  %v771_v28 = vsel %vm314_vm0, %v1555_v23, 0.0  ;;  %v765_v34 = vrot.slane %v764_v27, 4 }
 0x15c   : > { %v788_v33 = vrot.slane %v787_v26, 2  ;;  %v772_v35 = vrot.slane %v771_v28, 4  ;;  %v815_v45 = vand.u32 2147483647, %v756_v17  ;;  %v748_v46 = vmul.f32 1.442695, %v733_v29 }
 0x15d   : > { %v782_v30 = vadd.f32 %v781_v25, %v780_v21  ;;  %v766_v40 = vadd.f32 %v765_v34, %v764_v27  ;;  %1206 = vpow2.f32 %v746_v36  ;;  %v817_v50 = vand.u32 2147483648, %v756_v17 }
 0x15e   : > { %v789_v39 = vadd.f32 %v788_v33, %v787_v26  ;;  %v773_v31 = vadd.f32 %v772_v35, %v771_v28  ;;  %v830_v54 = vand.u32 2147483647, %v1553_v20  ;;  %v832_v55 = vand.u32 2147483648, %v1553_v20 }
 0x15f   : > { %v783_v38 = vrot.slane %v782_v30, 1  ;;  %v767_v51 = vrot.slane %v766_v40, 2  ;;  %vm811_vm5 = vweird.f32 %v756_v17  ;;  %v818_v63 = vor.u32 1.1754944e-38, %v817_v50 }
 0x160   : > { %v1203_v37 = vpop.eup %1202  ;;  %v790_v49 = vrot.slane %v789_v39, 1  ;;  %v774_v52 = vrot.slane %v773_v31, 2  ;;  %vm826_vm7 = vweird.f32 %v1553_v20  ;;  %vm816_vm8 = vcmp.eq.f32.partialorder %v815_v45, 8.507059e+37 }
 0x161   : > { %v1205_v41 = vpop.eup %1204  ;;  %v807_v43 = vmul.f32 %v1203_v37, %v756_v17  ;;  %v1565_v48 = vadd.f32 %v783_v38, %v782_v30  ;;  %vm812_vm3 = vweird.f32 %v1203_v37  ;;  %v768_v58 = vadd.f32 %v767_v51, %v766_v40 }
 0x162   : > { %v822_v47 = vmul.f32 %v1205_v41, %v1553_v20  ;;  %v1570_v57 = vadd.f32 %v790_v49, %v789_v39  ;;  %vm827_vm4 = vweird.f32 %v1205_v41  ;;  %v775_v60 = vadd.f32 %v774_v52, %v773_v31  ;;  %vm813_vm6 = vmor %vm811_vm5, %vm812_vm3 }
 0x163   : > { %v808_v32 = vsub.f32 1.0, %v807_v43  ;;  %1208 = vrcp.f32 %v1565_v48  ;;  %v1573_v62 = vpop.eup %1206  ;;  %v769_v1 = vrot.slane %v768_v58, 1  ;;  %vm828_vm9 = vmor %vm826_vm7, %vm827_vm4  ;;  %v833_v3 = vor.u32 1.1754944e-38, %v832_v55 }
 0x164   : > { %v823_v53 = vsub.f32 1.0, %v822_v47  ;;  %1210 = vpow2.f32 %v748_v46  ;;  %v776_v4 = vrot.slane %v775_v60, 1  ;;  %vm831_vm10 = vcmp.eq.f32.partialorder %v830_v54, 8.507059e+37 }
 0x165   : > { %v809_v56 = vmul.f32 %v1203_v37, %v808_v32  ;;  %1212 = vrcp.f32 %v1570_v57  ;;  %v792_v12 = vsel %vm314_vm0, %v1573_v62, 0.0  ;;  %v1582_v15 = vadd.f32 %v769_v1, %v768_v58 }
 0x166   : > { %v824_v59 = vmul.f32 %v1205_v41, %v823_v53  ;;  %v1584_v16 = vadd.f32 %v776_v4, %v775_v60  ;;  %v793_v24 = vrot.slane %v792_v12, 4  ;;  %v875_v26 = vand.u32 2147483647, %v1565_v48 }
 0x167   : > { %v810_v61 = vadd.f32 %v1203_v37, %v809_v56  ;;  %1214 = vrcp.f32 %v1582_v15  ;;  %vm871_vm12 = vweird.f32 %v1565_v48  ;;  %v890_v30 = vand.u32 2147483647, %v1570_v57 }
 0x168   : > { %v825_v0 = vadd.f32 %v1205_v41, %v824_v59  ;;  %1216 = vrcp.f32 %v1584_v16  ;;  %v892_v33 = vand.u32 2147483648, %v1570_v57  ;;  %v794_v35 = vadd.f32 %v793_v24, %v792_v12 }
 0x169   : > { %v814_v2 = vsel %vm813_vm6, %v1203_v37, %v810_v61  ;;  %v1209_v5 = vpop.eup %1208  ;;  %vm1607_vm15 = vcmp.eq.f32.partialorder %v875_v26, 8.507059e+37  ;;  %vm886_vm1 = vweird.f32 %v1570_v57  ;;  %vm891_vm3 = vcmp.eq.f32.partialorder %v890_v30, 8.507059e+37 }
 0x16a   : > { %v819_v6 = vsel %vm816_vm8, %v818_v63, %v814_v2  ;;  %v829_v7 = vsel %vm828_vm9, %v1205_v41, %v825_v0  ;;  %v867_v8 = vmul.f32 %v1209_v5, %v1565_v48  ;;  %v1579_v13 = vpop.eup %1210  ;;  %vm872_vm11 = vweird.f32 %v1209_v5 }
 0x16b   : > { %v834_v10 = vsel %vm831_vm10, %v833_v3, %v829_v7  ;;  %v1213_v17 = vpop.eup %1212  ;;  %v820_v18 = vmul.f32 %v1535_v44, %v819_v6  ;;  %v799_v27 = vsel %vm314_vm0, %v1579_v13, 0.0  ;;  %vm1603_vm14 = vmor %vm871_vm12, %vm872_vm11  ;;  %v795_v43 = vrot.slane %v794_v35, 2 }
 0x16c   : > { %v835_v14 = vmul.f32 %v1537_v42, %v834_v10  ;;  %v868_v20 = vsub.f32 1.0, %v867_v8  ;;  %v882_v22 = vmul.f32 %v1213_v17, %v1570_v57  ;;  %v877_v42 = vand.u32 2147483648, %v1565_v48 }
 0x16d   : > { %vm887_vm13 = vweird.f32 %v1213_v17  ;;  %v800_v36 = vrot.slane %v799_v27, 4  ;;  %v1215_v40 = vpop.eup %1214  ;;  %v893_v45 = vor.u32 1.1754944e-38, %v892_v33  ;;  %vm841_vm4 = vweird.f32 %v1582_v15 }
 0x16e   : > { %v934_v21 = vrot.slane %v835_v14, 4  ;;  %v869_v25 = vmul.f32 %v1209_v5, %v868_v20  ;;  %v883_v44 = vsub.f32 1.0, %v882_v22  ;;  %v878_v39 = vor.u32 1.1754944e-38, %v877_v42  ;;  %vm888_vm2 = vmor %vm886_vm1, %vm887_vm13  ;;  %v1217_v48 = vpop.eup %1216 }
 0x16f   : > { %v837_v46 = vmul.f32 %v1215_v40, %v1582_v15  ;;  %v801_v47 = vadd.f32 %v800_v36, %v799_v27  ;;  %v845_v32 = vand.u32 2147483647, %v1582_v15  ;;  %v796_v50 = vadd.f32 %v795_v43, %v794_v35 }
 0x170   : > { %v938_v28 = vsel %vm314_vm0, %v820_v18, %v934_v21  ;;  %v870_v29 = vadd.f32 %v1209_v5, %v869_v25  ;;  %v884_v34 = vmul.f32 %v1213_v17, %v883_v44  ;;  %v852_v54 = vmul.f32 %v1217_v48, %v1584_v16 }
 0x171   : > { %946 = vst [vmem:[%s1600_s7] sm:$0xff] %v938_v28  ;;  %v838_v53 = vsub.f32 1.0, %v837_v46  ;;  %v847_v56 = vand.u32 2147483648, %v1582_v15  ;;  %v797_v57 = vrot.slane %v796_v50, 1  ;;  %v802_v58 = vrot.slane %v801_v47, 2 }
 0x172   : > { %v874_v31 = vsel %vm1603_vm14, %v1209_v5, %v870_v29  ;;  %v885_v41 = vadd.f32 %v1213_v17, %v884_v34  ;;  %vm842_vm5 = vweird.f32 %v1215_v40  ;;  %v853_v60 = vsub.f32 1.0, %v852_v54 }
 0x173   : > { %v879_v51 = vsel %vm1607_vm15, %v878_v39, %v874_v31  ;;  %v839_v59 = vmul.f32 %v1215_v40, %v838_v53  ;;  %v862_v61 = vand.u32 2147483648, %v1584_v16  ;;  %v798_v1 = vadd.f32 %v797_v57, %v796_v50  ;;  %vm843_vm7 = vmor %vm841_vm4, %vm842_vm5 }
 0x174   : > { %v889_v49 = vsel %vm888_vm2, %v1213_v17, %v885_v41  ;;  %v880_v63 = vmul.f32 %v1543_v9, %v879_v51  ;;  %v803_v2 = vadd.f32 %v802_v58, %v801_v47  ;;  %v854_v4 = vmul.f32 %v1217_v48, %v853_v60 }
 0x175   : > { %v894_v52 = vsel %vm891_vm3, %v893_v45, %v889_v49  ;;  %v840_v3 = vadd.f32 %v1215_v40, %v839_v59  ;;  %vm857_vm6 = vweird.f32 %v1217_v48  ;;  %1218 = vrcp.f32 %v798_v1 }
 0x176   : > { %v895_v55 = vmul.f32 %v1545_v11, %v894_v52  ;;  %v860_v11 = vand.u32 2147483647, %v1584_v16  ;;  %v855_v7 = vadd.f32 %v1217_v48, %v854_v4  ;;  %vm856_vm8 = vweird.f32 %v1584_v16 }
 0x177   : > { %v844_v6 = vsel %vm843_vm7, %v1215_v40, %v840_v3  ;;  %v804_v10 = vrot.slane %v803_v2, 1  ;;  %v848_v9 = vor.u32 1.1754944e-38, %v847_v56  ;;  %vm858_vm9 = vmor %vm856_vm8, %vm857_vm6  ;;  %v863_v8 = vor.u32 1.1754944e-38, %v862_v61 }
 0x178   : > { %v936_v0 = vrot.slane %v895_v55, 4  ;;  %vm846_vm10 = vcmp.eq.f32.partialorder %v845_v32, 8.507059e+37  ;;  %v859_v12 = vsel %vm858_vm9, %v1217_v48, %v855_v7  ;;  %vm861_vm11 = vcmp.eq.f32.partialorder %v860_v11, 8.507059e+37 }
 0x179   : > { %v805_v14 = vadd.f32 %v804_v10, %v803_v2  ;;  %v849_v17 = vsel %vm846_vm10, %v848_v9, %v844_v6  ;;  %v864_v15 = vsel %vm861_vm11, %v863_v8, %v859_v12  ;;  %vm901_vm13 = vweird.f32 %v798_v1 }
 0x17a   : > { %v940_v5 = vsel %vm314_vm0, %v880_v63, %v936_v0  ;;  %v865_v18 = vmul.f32 %v1555_v23, %v864_v15  ;;  %v850_v16 = vmul.f32 %v1551_v19, %v849_v17  ;;  %v907_v23 = vand.u32 2147483648, %v798_v1 }
 0x17b   : > { %948 = vst [vmem:[%s1600_s7 + $0x10] sm:$0xff] %v940_v5  ;;  %1220 = vrcp.f32 %v805_v14  ;;  %v1219_v20 = vpop.eup %1218  ;;  %v922_v29 = vand.u32 2147483648, %v805_v14  ;;  %v905_v30 = vand.u32 2147483647, %v798_v1  ;;  %v920_v33 = vand.u32 2147483647, %v805_v14 }
 0x17c   : > { %v935_v21 = vrot.slane %v865_v18, 4  ;;  %v897_v22 = vmul.f32 %v1219_v20, %v798_v1  ;;  %vm902_vm12 = vweird.f32 %v1219_v20  ;;  %vm916_vm1 = vweird.f32 %v805_v14 }
 0x17d   : > { %vm903_vm15 = vmor %vm901_vm13, %vm902_vm12  ;;  %v908_v36 = vor.u32 1.1754944e-38, %v907_v23  ;;  %v923_v37 = vor.u32 1.1754944e-38, %v922_v29  ;;  %vm906_vm3 = vcmp.eq.f32.partialorder %v905_v30, 8.507059e+37  ;;  %vm921_vm4 = vcmp.eq.f32.partialorder %v920_v33, 8.507059e+37 }
 0x17e   : > { %v939_v24 = vsel %vm314_vm0, %v850_v16, %v935_v21  ;;  %v898_v25 = vsub.f32 1.0, %v897_v22 }
 0x17f   : > { %947 = vst [vmem:[%s1600_s7 + $0x8] sm:$0xff] %v939_v24 }
 0x180   : > { %v899_v42 = vmul.f32 %v1219_v20, %v898_v25 }
 0x181   : > { %v1221_v26 = vpop.eup %1220 }
 0x182   : > { %v912_v27 = vmul.f32 %v1221_v26, %v805_v14  ;;  %v900_v28 = vadd.f32 %v1219_v20, %v899_v42  ;;  %vm917_vm14 = vweird.f32 %v1221_v26 }
 0x183   : > { %vm918_vm2 = vmor %vm916_vm1, %vm917_vm14 }
 0x184   : > { %v913_v44 = vsub.f32 1.0, %v912_v27  ;;  %v904_v34 = vsel %vm903_vm15, %v1219_v20, %v900_v28 }
 0x185   : > { %v909_v39 = vsel %vm906_vm3, %v908_v36, %v904_v34 }
 0x186   : > { %v914_v19 = vmul.f32 %v1221_v26, %v913_v44  ;;  %v910_v41 = vmul.f32 %v1573_v62, %v909_v39 }
 0x188   : > { %v915_v35 = vadd.f32 %v1221_v26, %v914_v19 }
 0x18a   : > { %v919_v38 = vsel %vm918_vm2, %v1221_v26, %v915_v35 }
 0x18b   : > { %v924_v40 = vsel %vm921_vm4, %v923_v37, %v919_v38 }
 0x18c   : > { %v925_v31 = vmul.f32 %v1579_v13, %v924_v40 }
 0x18e   : > { %v937_v43 = vrot.slane %v925_v31, 4 }
 0x190   : > { %v941_v45 = vsel %vm314_vm0, %v910_v41, %v937_v43 }
 0x191   : > { %949 = vst [vmem:[%s1600_s7 + $0x18] sm:$0xff] %v941_v45 }
 0x192   : > { %1279 = shalt.err (!%p1276_p13)
}
 0x193   : > { %1112 = dma.vmem_to_hbm [thread:$0]  (%p1448_p9), %s967_s17, 512, %s969_s8, %s951_s26  }
 0x194 PF: > { %p1123_p0 = scmp.ge.s32.totalorder %s1350_s25, 2  ;;  %s980_s7 = sand.u32 1, %s1322_s18  }
 0x195   : > { %s981_s28 = scalar_lea.sflag [#allocation4], %s980_s7 }
 0x196   : > { %p1119_p1 = pnand %p1123_p0, %p1454_p12 }
 0x198   : > { %p1120_p2 = pneg %p1119_p1 }
 0x19a   : > { %1317 = dma.done.wait (%p1120_p2), %s981_s28, 512  }
 0x19b   : > { %1319 = vsyncadd (%p1120_p2), %s981_s28, 4294966784  ;;  %s21_s25 = sadd.s32 1, %s1350_s25   ;;  %s1704_s9 = sld [smem:[#allocation8_spill]] }
 0x19c   : > { %p18_p4 = scmp.ge.s32.totalorder %s21_s25, 6   ;;  %s1705_s12 = sld [smem:[#allocation9_spill]] }
 0x19d   : > { %s1706_s18 = smov %s1326_s19  ;;  %s1707_s19 = smov %s1330_s20 }
 0x19e   : > { %s1708_s20 = smov %s1461_s14  ;;  %s1709_s21 = smov %s1342_s23 }
 0x19f   : > { %s1710_s22 = smov %s1346_s24  ;;  %20 = sbr.rel (!%p18_p4) target bundleno = 7 (0x7), region = 91 }
 0x1a1   : > { %s1711_s23 = smov %s1704_s9 }
 0x1a2   : > { %s1712_s24 = smov %s1705_s12 }
 0x1a4   :  { %987 = vsyncpa [#allocation3], 1 }
 0x1a5   :  { %989 = vsyncpa [#allocation3 + $0x1], 1 }
 0x1a6   :  { %990 = vsyncpa [#allocation4], 1 }
 0x1a7   :  { %992 = vsyncpa [#allocation4 + $0x1], 1 }

</bundles_post_ra>
